<compile_context>
chip_gen: v7x
topology: tpu7x:2x2x1
jax: 0.10.0
libtpu: 0.0.40
codegen_flags: <defaults>
</compile_context>

<pallas_src>
import jax
import jax.numpy as jnp
from jax.experimental import pallas as pl
from jax.experimental.pallas import tpu as pltpu


USE_BF16 = True  # set False for bit-faithful f32 numerics vs the PyTorch module


def _round_up(x: int, m: int) -> int:
    return (x + m - 1) // m * m


def _make_snn_kernel(num_spiking_layers: int):
    """Fused kernel for `num_spiking_layers` spiking layers + non-spiking readout."""

    def kernel(*refs):
        # refs layout:
        #   refs[0]                       : z tile     (TB, S0)
        #   refs[1 + 2*l], refs[2 + 2*l]  : W_l (S_l, S_{l+1}), thresh_l (1, S_{l+1})
        #   refs[1 + 2*L]                 : W_out (S_L, O_pad)  (pre-scaled by 1.3)
        #   refs[2 + 2*L]                 : out tile   (TB, O_pad)
        z = refs[0][...]
        for l in range(num_spiking_layers):
            w_ref = refs[1 + 2 * l]
            th_ref = refs[2 + 2 * l]
            # MXU matmul with f32 accumulation.
            i = jnp.dot(z, w_ref[...], preferred_element_type=jnp.float32)
            # SpikeFunction.forward: (v - thresh) > 0  <=>  i > thresh (f32 compare).
            z = (i > th_ref[...]).astype(z.dtype)  # spikes are exactly 0/1
        w_out_ref = refs[1 + 2 * num_spiking_layers]
        out_ref = refs[2 + 2 * num_spiking_layers]
        i_out = jnp.dot(
            z.astype(w_out_ref.dtype), w_out_ref[...],
            preferred_element_type=jnp.float32,
        )
        # LIF_no_thres with zero state: v = -0.8 + 1.3 * i  (1.3 folded into W_out).
        out_ref[...] = i_out - 0.8

    return kernel


def snn_forward(z, spiking_weights, spiking_thresh, w_out, *, batch_tile=128):
    """Run the fused SNN forward pass.

    Args:
      z:                (B, S0) input (f32 or bf16), already in "prepared" dtype.
      spiking_weights:  list of (S_l, S_{l+1}) weights (pre-transposed, prepared dtype).
      spiking_thresh:   list of (1, S_{l+1}) f32 thresholds.
      w_out:            (S_L, O) f32 readout weight, pre-transposed and pre-scaled by 1.3.
    Returns:
      (B, O) f32 membrane potential of the readout layer.
    """
    num_layers = len(spiking_weights)
    B, S0 = z.shape
    out_dim = w_out.shape[1]

    # Lane-dense output: pad readout columns to a multiple of 128 (zero columns
    # contribute nothing; sliced off after the call).
    out_pad = _round_up(out_dim, 128)
    if out_pad != out_dim:
        w_out = jnp.pad(w_out, ((0, 0), (0, out_pad - out_dim)))

    # Batch tiling (sublane-aligned); pad batch so every grid step is a full tile.
    tb = min(batch_tile, _round_up(B, 8))
    b_pad = _round_up(B, tb)
    if b_pad != B:
        z = jnp.pad(z, ((0, b_pad - B), (0, 0)))
    grid = (b_pad // tb,)

    operands = [z]
    in_specs = [pl.BlockSpec((tb, S0), lambda i: (i, 0))]
    for w, th in zip(spiking_weights, spiking_thresh):
        operands.extend([w, th])
        # Constant index_map -> weight/threshold block stays resident in VMEM.
        in_specs.append(pl.BlockSpec(w.shape, lambda i: (0, 0)))
        in_specs.append(pl.BlockSpec(th.shape, lambda i: (0, 0)))
    operands.append(w_out)
    in_specs.append(pl.BlockSpec(w_out.shape, lambda i: (0, 0)))

    out = pl.pallas_call(
        _make_snn_kernel(num_layers),
        out_shape=jax.ShapeDtypeStruct((b_pad, out_pad), jnp.float32),
        grid=grid,
        in_specs=in_specs,
        out_specs=pl.BlockSpec((tb, out_pad), lambda i: (i, 0)),
        compiler_params=pltpu.CompilerParams(
            dimension_semantics=("parallel",),       # megacore sharding on v7x
            vmem_limit_bytes=48 * 1024 * 1024,       # headroom for resident weights
        ),
    )(*operands)
    return out[:B, :out_dim]


def init_snn_params(key, snn_sizes, output_size):
    """Parameter init mirroring the PyTorch module's shapes (f32).

    nn.Linear(in, out, bias=False) default init: U(-1/sqrt(in), 1/sqrt(in)).
    LIF.thresh: U(0.7, 0.999). (v_decay is created in PyTorch but unused here.)
    Weights are returned pre-transposed to (in, out).
    """
    spiking_weights, spiking_thresh = [], []
    for i in range(len(snn_sizes) - 1):
        in_f, out_f = snn_sizes[i], snn_sizes[i + 1]
        key, kw, kt = jax.random.split(key, 3)
        bound = 1.0 / jnp.sqrt(jnp.float32(in_f))
        w = jax.random.uniform(kw, (in_f, out_f), jnp.float32, -bound, bound)
        th = jax.random.uniform(kt, (1, out_f), jnp.float32, 0.7, 0.999)
        spiking_weights.append(w)
        spiking_thresh.append(th)

    in_f = snn_sizes[-1]
    key, kw = jax.random.split(key)
    bound = 1.0 / jnp.sqrt(jnp.float32(in_f))
    w_out = jax.random.uniform(kw, (in_f, output_size), jnp.float32, -bound, bound)
    return spiking_weights, spiking_thresh, w_out


def prepare_params(z, spiking_weights, spiking_thresh, w_out, use_bf16=USE_BF16):
    """Cast to kernel dtypes and fold the readout 1.3 scale into W_out.

    Spiking-layer weights / activations go to bf16 (single-pass MXU); thresholds
    and the readout weight stay f32.
    """
    act_dtype = jnp.bfloat16 if use_bf16 else jnp.float32
    z_p = z.astype(act_dtype)
    sw_p = [w.astype(act_dtype) for w in spiking_weights]
    th_p = [th.astype(jnp.float32) for th in spiking_thresh]
    w_out_p = (1.3 * w_out).astype(jnp.float32)
    return z_p, sw_p, th_p, w_out_p


def snn_reference(z, spiking_weights, spiking_thresh, w_out_scaled):
    """Pure-JAX reference using the same prepared params / dtypes as the kernel."""
    for w, th in zip(spiking_weights, spiking_thresh):
        i = jnp.dot(z, w, preferred_element_type=jnp.float32)
        z = (i > th).astype(z.dtype)
    i_out = jnp.dot(z.astype(w_out_scaled.dtype), w_out_scaled,
                    preferred_element_type=jnp.float32)
    return i_out - 0.8


if __name__ == "__main__":
    key = jax.random.PRNGKey(0)

    # Small shapes consistent with the module: SNN(snn_sizes=[32, 64, 64], output_size=8)
    snn_sizes = [32, 64, 64]
    output_size = 8
    batch = 4

    key, k_in = jax.random.split(key)
    z_in = jax.random.uniform(k_in, (batch, snn_sizes[0]), jnp.float32, 0.0, 1.0)

    sw, th, w_out = init_snn_params(key, snn_sizes, output_size)
    z_p, sw_p, th_p, w_out_p = prepare_params(z_in, sw, th, w_out)

    out = snn_forward(z_p, sw_p, th_p, w_out_p)
    out = jax.block_until_ready(out)

    ref = snn_reference(z_p, sw_p, th_p, w_out_p)
    assert out.shape == (batch, output_size)
    assert jnp.allclose(out, ref, atol=1e-5, rtol=1e-5), "mismatch vs reference"

    print("KERNEL_OK")
</pallas_src>

<mosaic_0001>
module attributes {stable_mosaic.version = 11 : i64} {
  func.func @kernel(%arg0: i32, %arg1: memref<8x32xbf16, #tpu.memory_space<vmem>>, %arg2: memref<32x64xbf16, #tpu.memory_space<vmem>>, %arg3: memref<1x64xf32, #tpu.memory_space<vmem>>, %arg4: memref<64x64xbf16, #tpu.memory_space<vmem>>, %arg5: memref<1x64xf32, #tpu.memory_space<vmem>>, %arg6: memref<64x128xf32, #tpu.memory_space<vmem>>, %arg7: memref<8x128xf32, #tpu.memory_space<vmem>>) attributes {dimension_semantics = [#tpu.dimension_semantics<parallel>], iteration_bounds = array<i64: 1>, scalar_prefetch = 0 : i64, scratch_operands = 0 : i64, tpu.core_type = #tpu.core_type<tc>, window_params = [{transform_indices = @transform_0, window_bounds = array<i64: 8, 32>}, {pipeline_mode = #tpu.pipeline_mode<synchronous>, transform_indices = @transform_1, window_bounds = array<i64: 32, 64>}, {pipeline_mode = #tpu.pipeline_mode<synchronous>, transform_indices = @transform_2, window_bounds = array<i64: 1, 64>}, {pipeline_mode = #tpu.pipeline_mode<synchronous>, transform_indices = @transform_3, window_bounds = array<i64: 64, 64>}, {pipeline_mode = #tpu.pipeline_mode<synchronous>, transform_indices = @transform_4, window_bounds = array<i64: 1, 64>}, {pipeline_mode = #tpu.pipeline_mode<synchronous>, transform_indices = @transform_5, window_bounds = array<i64: 64, 128>}, {transform_indices = @transform_6, window_bounds = array<i64: 8, 128>}]} {
    %c0 = arith.constant 0 : index
    %c0_0 = arith.constant 0 : index
    %0 = vector.load %arg1[%c0, %c0_0] : memref<8x32xbf16, #tpu.memory_space<vmem>>, vector<8x32xbf16>
    %c0_1 = arith.constant 0 : index
    %c0_2 = arith.constant 0 : index
    %1 = vector.load %arg2[%c0_1, %c0_2] : memref<32x64xbf16, #tpu.memory_space<vmem>>, vector<32x64xbf16>
    %cst = arith.constant dense<0.000000e+00> : vector<8x64xf32>
    %2 = tpu.matmul %0, %1, %cst {dimension_numbers = #tpu.dot_dimension_numbers<[1], [0], [0], [1], [0, 0, 1, 1], [], []>} : vector<8x32xbf16>, vector<32x64xbf16>, vector<8x64xf32> -> vector<8x64xf32>
    %c0_3 = arith.constant 0 : index
    %c0_4 = arith.constant 0 : index
    %3 = vector.load %arg3[%c0_3, %c0_4] : memref<1x64xf32, #tpu.memory_space<vmem>>, vector<1x64xf32>
    %4 = vector.broadcast %3 : vector<1x64xf32> to vector<8x64xf32>
    %5 = arith.cmpf ogt, %2, %4 : vector<8x64xf32>
    %6 = arith.extui %5 : vector<8x64xi1> to vector<8x64xi32>
    %7 = arith.sitofp %6 : vector<8x64xi32> to vector<8x64xf32>
    %8 = arith.truncf %7 : vector<8x64xf32> to vector<8x64xbf16>
    %c0_5 = arith.constant 0 : index
    %c0_6 = arith.constant 0 : index
    %9 = vector.load %arg4[%c0_5, %c0_6] : memref<64x64xbf16, #tpu.memory_space<vmem>>, vector<64x64xbf16>
    %cst_7 = arith.constant dense<0.000000e+00> : vector<8x64xf32>
    %10 = tpu.matmul %8, %9, %cst_7 {dimension_numbers = #tpu.dot_dimension_numbers<[1], [0], [0], [1], [0, 0, 1, 1], [], []>} : vector<8x64xbf16>, vector<64x64xbf16>, vector<8x64xf32> -> vector<8x64xf32>
    %c0_8 = arith.constant 0 : index
    %c0_9 = arith.constant 0 : index
    %11 = vector.load %arg5[%c0_8, %c0_9] : memref<1x64xf32, #tpu.memory_space<vmem>>, vector<1x64xf32>
    %12 = vector.broadcast %11 : vector<1x64xf32> to vector<8x64xf32>
    %13 = arith.cmpf ogt, %10, %12 : vector<8x64xf32>
    %14 = arith.extui %13 : vector<8x64xi1> to vector<8x64xi32>
    %15 = arith.sitofp %14 : vector<8x64xi32> to vector<8x64xf32>
    %16 = arith.truncf %15 : vector<8x64xf32> to vector<8x64xbf16>
    %17 = arith.extf %16 : vector<8x64xbf16> to vector<8x64xf32>
    %c0_10 = arith.constant 0 : index
    %c0_11 = arith.constant 0 : index
    %18 = vector.load %arg6[%c0_10, %c0_11] : memref<64x128xf32, #tpu.memory_space<vmem>>, vector<64x128xf32>
    %cst_12 = arith.constant dense<0.000000e+00> : vector<8x128xf32>
    %19 = tpu.matmul %17, %18, %cst_12 {dimension_numbers = #tpu.dot_dimension_numbers<[1], [0], [0], [1], [0, 0, 1, 1], [], []>} : vector<8x64xf32>, vector<64x128xf32>, vector<8x128xf32> -> vector<8x128xf32>
    %cst_13 = arith.constant 8.000000e-01 : f32
    %20 = vector.broadcast %cst_13 : f32 to vector<8x128xf32>
    %21 = arith.subf %19, %20 : vector<8x128xf32>
    %c0_14 = arith.constant 0 : index
    %c0_15 = arith.constant 0 : index
    %22 = vector.load %arg7[%c0_14, %c0_15] : memref<8x128xf32, #tpu.memory_space<vmem>>, vector<8x128xf32>
    tpu.vector_store %arg7[%c0_14, %c0_15], %21 {strides = array<i32>} : memref<8x128xf32, #tpu.memory_space<vmem>>, vector<8x128xf32>,
    return
  }
  func.func @transform_0(%arg0: i32) -> (i32, i32) {
    %c0_i32 = arith.constant 0 : i32
    %c0_i32_0 = arith.constant 0 : i32
    return %arg0, %c0_i32 : i32, i32
  }
  func.func @transform_1(%arg0: i32) -> (i32, i32) {
    %c0_i32 = arith.constant 0 : i32
    %c0_i32_0 = arith.constant 0 : i32
    %c0_i32_1 = arith.constant 0 : i32
    return %c0_i32, %c0_i32_0 : i32, i32
  }
  func.func @transform_2(%arg0: i32) -> (i32, i32) {
    %c0_i32 = arith.constant 0 : i32
    %c0_i32_0 = arith.constant 0 : i32
    %c0_i32_1 = arith.constant 0 : i32
    return %c0_i32, %c0_i32_0 : i32, i32
  }
  func.func @transform_3(%arg0: i32) -> (i32, i32) {
    %c0_i32 = arith.constant 0 : i32
    %c0_i32_0 = arith.constant 0 : i32
    %c0_i32_1 = arith.constant 0 : i32
    return %c0_i32, %c0_i32_0 : i32, i32
  }
  func.func @transform_4(%arg0: i32) -> (i32, i32) {
    %c0_i32 = arith.constant 0 : i32
    %c0_i32_0 = arith.constant 0 : i32
    %c0_i32_1 = arith.constant 0 : i32
    return %c0_i32, %c0_i32_0 : i32, i32
  }
  func.func @transform_5(%arg0: i32) -> (i32, i32) {
    %c0_i32 = arith.constant 0 : i32
    %c0_i32_0 = arith.constant 0 : i32
    %c0_i32_1 = arith.constant 0 : i32
    return %c0_i32, %c0_i32_0 : i32, i32
  }
  func.func @transform_6(%arg0: i32) -> (i32, i32) {
    %c0_i32 = arith.constant 0 : i32
    %c0_i32_0 = arith.constant 0 : i32
    return %arg0, %c0_i32 : i32, i32
  }
}

</mosaic_0001>

<bundles_post_ra>
// kernel: tpu_custom_call.1
= control target key start
LH: loop header
LB: loop body
LE: loop exit
PB: predicated region body
PF: predicated region fallthrough
CT: control target
= control target key end

     0   :  { %11 = vsyncpa [#allocation3], 0  ;;  %s678_s0 = inlined_call_operand.hbm [shape: bf16[8,32], index: 0, kind: input, shape index: {}]   ;;  %s679_s1 = inlined_call_operand.hbm [shape: bf16[32,64], index: 1, kind: input, shape index: {}]   ;;  %s680_s2 = inlined_call_operand.vmem [shape: f32[1,64], index: 2, kind: input, shape index: {}]   ;;  %s681_s3 = inlined_call_operand.hbm [shape: bf16[64,64], index: 3, kind: input, shape index: {}]   ;;  %s682_s4 = inlined_call_operand.vmem [shape: f32[1,64], index: 4, kind: input, shape index: {}]   ;;  %s683_s5 = inlined_call_operand.hbm [shape: f32[64,128], index: 5, kind: input, shape index: {}]   ;;  %s684_s6 = inlined_call_operand.hbm [shape: f32[8,128], index: 6, kind: output, shape index: {}]  }
   0x1   :  { %12 = vsyncpa [#allocation6], 0 }
   0x2   :  { %13 = vsyncpa [#allocation9], 0 }
   0x3   :  { %14 = vsyncpa [#allocation4], 0  ;;  %s556_s21 = smov [#allocation5]   ;;  %s438_s25 = scalar_lea.hbm %s679_s1, 256 }
   0x4   :  { %s30_s22 = sshll.u32 %s556_s21, 4  ;;  %p439_p0 = scmp.ne.s32.totalorder %s679_s1, %s438_s25  ;;  %s31_s22 = int_to_ptr.vmem [resolvable:$true] %s30_s22 }
   0x5   :  { %p442_p1 = scmp.lt.u32.totalorder %s438_s25, %s679_s1 }
   0x7   :  { %p444_p2 = pnand %p442_p1, %p439_p0 }
   0x9   :  { %447 = shalt.err (!%p444_p2)
}
   0xa   :  { %s448_s30 = scalar_lea.vmem %s31_s22, 256  ;;  %p453_p4 = scmp.lt.s32.totalorder %s31_s22, %s31_s22 }
   0xb   :  { %p449_p3 = scmp.ne.s32.totalorder %s31_s22, %s448_s30  ;;  %p454_p5 = scmp.lt.s32.totalorder %s448_s30, %s448_s30 }
   0xd   :  { %p455_p6 = por %p454_p5, %p453_p4 }
   0xf   :  { %p456_p7 = pnand %p455_p6, %p449_p3 }
  0x11   :  { %459 = shalt.err (!%p456_p7)
}
  0x12   :  { %s557_s7 = smov 64   ;;  %s558_s8 = smov 4  }
  0x13   :  { %36 = dma.hbm_to_vmem [thread:$0]  %s679_s1, 256, %s31_s22, [#allocation6], %s557_s7, %s557_s7, %s558_s8  }
  0x14   :  { %s559_s11 = smov [#allocation2]   ;;  %s560_s13 = smov [#allocation7]  }
  0x15   :  { %s21_s12 = sshll.u32 %s559_s11, 4  ;;  %s44_s14 = sshll.u32 %s560_s13, 4  ;;  %s22_s12 = int_to_ptr.vmem [resolvable:$true] %s21_s12  ;;  %s45_s14 = int_to_ptr.vmem [resolvable:$true] %s44_s14 }
  0x16   :  { %s460_s17 = scalar_lea.hbm %s678_s0, 64 }
  0x17   :  { %p461_p8 = scmp.ne.s32.totalorder %s678_s0, %s460_s17  ;;  %p464_p9 = scmp.lt.u32.totalorder %s460_s17, %s678_s0 }
  0x19   :  { %p466_p10 = pnand %p464_p9, %p461_p8 }
  0x1b   :  { %469 = shalt.err (!%p466_p10)
}
  0x1c   :  { %s470_s1 = scalar_lea.vmem %s22_s12, 64  ;;  %p475_p12 = scmp.lt.s32.totalorder %s22_s12, %s22_s12 }
  0x1d   :  { %p471_p11 = scmp.ne.s32.totalorder %s22_s12, %s470_s1  ;;  %p476_p13 = scmp.lt.s32.totalorder %s470_s1, %s470_s1 }
  0x1f   :  { %p477_p0 = por %p476_p13, %p475_p12 }
  0x21   :  { %p478_p1 = pnand %p477_p0, %p471_p11 }
  0x23   :  { %481 = shalt.err (!%p478_p1)
}
  0x24   :  { %24 = dma.hbm_to_vmem [thread:$0]  %s678_s0, 64, %s22_s12, [#allocation3]  }
  0x25   :  { %s482_s26 = scalar_lea.hbm %s681_s3, 512 }
  0x26   :  { %p483_p2 = scmp.ne.s32.totalorder %s681_s3, %s482_s26  ;;  %p486_p3 = scmp.lt.u32.totalorder %s482_s26, %s681_s3 }
  0x28   :  { %p488_p4 = pnand %p486_p3, %p483_p2 }
  0x2a   :  { %491 = shalt.err (!%p488_p4)
}
  0x2b   :  { %s492_s9 = scalar_lea.vmem %s45_s14, 512  ;;  %p497_p6 = scmp.lt.s32.totalorder %s45_s14, %s45_s14 }
  0x2c   :  { %p493_p5 = scmp.ne.s32.totalorder %s45_s14, %s492_s9  ;;  %p498_p7 = scmp.lt.s32.totalorder %s492_s9, %s492_s9 }
  0x2e   :  { %p499_p8 = por %p498_p7, %p497_p6 }
  0x30   :  { %p500_p9 = pnand %p499_p8, %p493_p5 }
  0x32   :  { %503 = shalt.err (!%p500_p9)
}
  0x33   :  { %50 = dma.hbm_to_vmem [thread:$0]  %s681_s3, 512, %s45_s14, [#allocation6], %s557_s7, %s557_s7, %s558_s8  }
  0x34   :  { %s561_s11 = smov [#allocation8]   ;;  %s504_s16 = scalar_lea.hbm %s683_s5, 1024 }
  0x35   :  { %s58_s12 = sshll.u32 %s561_s11, 4  ;;  %p505_p10 = scmp.ne.s32.totalorder %s683_s5, %s504_s16  ;;  %s59_s12 = int_to_ptr.vmem [resolvable:$true] %s58_s12 }
  0x36   :  { %p508_p11 = scmp.lt.u32.totalorder %s504_s16, %s683_s5 }
  0x38   :  { %p510_p12 = pnand %p508_p11, %p505_p10 }
  0x3a   :  { %513 = shalt.err (!%p510_p12)
}
  0x3b   :  { %s514_s21 = scalar_lea.vmem %s59_s12, 1024  ;;  %p519_p0 = scmp.lt.s32.totalorder %s59_s12, %s59_s12 }
  0x3c   :  { %p515_p13 = scmp.ne.s32.totalorder %s59_s12, %s514_s21  ;;  %p520_p1 = scmp.lt.s32.totalorder %s514_s21, %s514_s21 }
  0x3e   :  { %p521_p2 = por %p520_p1, %p519_p0 }
  0x40   :  { %p522_p3 = pnand %p521_p2, %p515_p13 }
  0x42   :  { %525 = shalt.err (!%p522_p3)
}
  0x43   :  { %s562_s3 = smov 128   ;;  %s563_s7 = smov 8  }
  0x44   :  { %64 = dma.hbm_to_vmem [thread:$0]  %s683_s5, 1024, %s59_s12, [#allocation9], %s562_s3, %s562_s3, %s563_s7  }
  0x45   :  { %548 = dma.done.wait [#allocation3], 64  }
  0x46   :  { %549 = vsyncadd [#allocation3], 4294967232 }
  0x47   :  { %550 = dma.done.wait [#allocation6], 768  }
  0x48   :  { %551 = vsyncadd [#allocation6], 4294966528 }
  0x49   :  { %552 = dma.done.wait [#allocation9], 1024  }
  0x4a   :  { %553 = vsyncadd [#allocation9], 4294966272  ;;  %v564_v0 = vmov 0.0   ;;  %vm565_vm0 = vmmov 0   ;;  %v432_v1 = vld [vmem:[#allocation5] sm:$0xff]   ;;  %v433_v2 = vld [vmem:[#allocation5 + $0x8] sm:$0xff]  }
  0x4b   :  { %369 = vmatprep.subr.bf16.mxu0 %v564_v0  ;;  %373 = vmatprep.mubr.msk.bf16.mxu0 %vm565_vm0, %v564_v0  ;;  %v434_v3 = vld [vmem:[#allocation7] sm:$0xff]   ;;  %v435_v4 = vld [vmem:[#allocation7 + $0x8] sm:$0xff]   ;;  %vm95_vm1 = vcmask 261120   ;;  %v436_v6 = vld [vmem:[#allocation7 + $0x10] sm:$0xff]   ;;  %v566_v11 = vmov 0.0|0.0   ;;  %vm182_vm3 = vcmask 523264  }
  0x4c   :  { %377 = vmatprep.subr.bf16.mxu1 %v564_v0  ;;  %385 = vmatprep.mubr.msk.bf16.mxu1 %vm565_vm0, %v564_v0  ;;  %v78_v5 = vld [vmem:[#allocation2] sm:$0xf]  ;;  %v437_v7 = vld [vmem:[#allocation7 + $0x18] sm:$0xff]   ;;  %v238_v8 = vld [vmem:[#allocation8] sm:$0xff] }
  0x4d   :  { %370 = vmatpush3.bf16.msra.mxu0 %v432_v1  ;;  %378 = vmatpush3.bf16.msra.mxu1 %v434_v3  ;;  %v239_v9 = vld [vmem:[#allocation8 + $0x8] sm:$0xff]  ;;  %v240_v10 = vld [vmem:[#allocation8 + $0x10] sm:$0xff]  ;;  %v241_v13 = vld [vmem:[#allocation8 + $0x18] sm:$0xff] }
  0x4e   :  { %371 = vmatprep.subr.bf16.mxu0 %v564_v0  ;;  %379 = vmatprep.subr.bf16.mxu1 %v564_v0  ;;  %v409_v12 = vpack.c.bf16 %v239_v9, %v238_v8  ;;  %v412_v14 = vpack.c.bf16 %v241_v13, %v240_v10  ;;  %v242_v15 = vld [vmem:[#allocation8 + $0x20] sm:$0xff]  ;;  %v243_v16 = vld [vmem:[#allocation8 + $0x28] sm:$0xff]  ;;  %v244_v25 = vld [vmem:[#allocation8 + $0x30] sm:$0xff] }
  0x4f   :  { %v415_v17 = vpack.c.bf16 %v243_v16, %v242_v15  ;;  %v341_v18 = vld [vmem:[%s680_s2] ss:$0 sm:$0xff]  ;;  %v245_v26 = vld [vmem:[#allocation8 + $0x38] sm:$0xff]  ;;  %s567_s2 = smov [#allocation10]  }
  0x50   :  { %v418_v27 = vpack.c.bf16 %v245_v26, %v244_v25  ;;  %v348_v28 = vld [vmem:[%s682_s4] ss:$0 sm:$0xff]  ;;  %s327_s24 = sshll.u32 %s567_s2, 4  ;;  %s328_s24 = int_to_ptr.vmem [resolvable:$true] %s327_s24 }
  0x51   :  { %372 = vmatpush3.bf16.msra.mxu0 %v433_v2  ;;  %380 = vmatpush3.bf16.msra.mxu1 %v435_v4  ;;  %s526_s25 = scalar_lea.vmem %s328_s24, 128  ;;  %p531_p5 = scmp.lt.s32.totalorder %s328_s24, %s328_s24 }
  0x52   :  { %381 = vmatprep.subr.bf16.mxu1 %v564_v0  ;;  %408 = vmatprep.subr.bf16.mxu0 %v566_v11  ;;  %p527_p4 = scmp.ne.s32.totalorder %s328_s24, %s526_s25  ;;  %p532_p6 = scmp.lt.s32.totalorder %s526_s25, %s526_s25 }
  0x54   :  { %374 = vmatmul.mubr.msk.bf16.vlgmr.msra.gmra.mrb[0].mxu0 %vm95_vm1, %v78_v5  ;;  %p533_p7 = por %p532_p6, %p531_p5 }
  0x55   :  { %405 = vmatprep.mubr.msk.f32.mxu0 %vm565_vm0, %v564_v0  ;;  %382 = vmatpush3.bf16.msra.mxu1 %v436_v6 }
  0x56   :  { %383 = vmatprep.subr.bf16.mxu1 %v564_v0  ;;  %410 = vmatpush3.bf16.msra.mxu0 %v409_v12  ;;  %p534_p8 = pnand %p533_p7, %p527_p4 }
  0x57   :  { %411 = vmatprep.subr.bf16.mxu0 %v566_v11 }
  0x59   :  { %384 = vmatpush3.bf16.msra.mxu1 %v437_v7 }
  0x5a   :  { %413 = vmatpush3.bf16.msra.mxu0 %v412_v14 }
  0x5b   :  { %414 = vmatprep.subr.bf16.mxu0 %v566_v11 }
  0x5e   :  { %416 = vmatpush3.bf16.msra.mxu0 %v415_v17 }
  0x5f   :  { %417 = vmatprep.subr.bf16.mxu0 %v566_v11 }
  0x62   :  { %419 = vmatpush3.bf16.msra.mxu0 %v418_v27 }
 0x127   :  { %v133_v19 = vpop.f32.mrb[0].mxu0 }
 0x128   :  { %vm146_vm2 = vcmp.gt.f32.partialorder %v133_v19, %v341_v18  ;;  %v375_v20 = vpop.f32.mrb[1].mxu0 }
 0x129   :  { %v342_v21 = vsel %vm146_vm2, 1.0, %v564_v0  ;;  %v136_v22 = vpop.f32.mrb[2].mxu0 }
 0x12a   :  { %v149_v23 = vpack.c.bf16 %v342_v21, %v342_v21  ;;  %v376_v24 = vpop.f32.mrb[3].mxu0 }
 0x12c   :  { %386 = vmatmul.mubr.msk.bf16.vlgmr.msra.gmra.mrb[0].mxu1 %vm182_vm3, %v149_v23 }
 0x1ff   :  { %v220_v29 = vpop.f32.mrb[0].mxu1 }
 0x200   :  { %vm233_vm4 = vcmp.gt.f32.partialorder %v220_v29, %v348_v28  ;;  %v387_v30 = vpop.f32.mrb[1].mxu1 }
 0x201   :  { %v349_v31 = vsel %vm233_vm4, 1.0, %v564_v0  ;;  %v223_v32 = vpop.f32.mrb[2].mxu1 }
 0x202   :  { %v388_v33 = vpop.f32.mrb[3].mxu1  ;;  %406 = vmatmul.mubr.msk.f32.vlgmr.msra.gmra.mrb[4].mxu0 %vm182_vm3, %v349_v31 }
 0x2d5   :  { %v315_v34 = vpop.f32.mrb[4].mxu0 }
 0x2d6   :  { %v351_v35 = vadd.f32 -0.8, %v315_v34  ;;  %v407_v36 = vpop.f32.mrb[5].mxu0 }
 0x2d8   :  { %320 = vst [vmem:[#allocation10] sm:$0xff] %v351_v35 }
 0x2d9   :  { %537 = shalt.err (!%p534_p8)
}
 0x2da   :  { %s538_s27 = scalar_lea.hbm %s684_s6, 128 }
 0x2db   :  { %p539_p9 = scmp.ne.s32.totalorder %s684_s6, %s538_s27  ;;  %p542_p10 = scmp.lt.u32.totalorder %s538_s27, %s684_s6 }
 0x2dd   :  { %p544_p11 = pnand %p542_p10, %p539_p9 }
 0x2df   :  { %547 = shalt.err (!%p544_p11)
}
 0x2e0   :  { %330 = dma.vmem_to_hbm [thread:$0]  %s328_s24, 128, %s684_s6, [#allocation4]  }
 0x2e1   :  { %554 = dma.done.wait [#allocation4], 128  }
 0x2e2   :  { %555 = vsyncadd [#allocation4], 4294967168 }
 0x2e3   :  { %334 = vsyncpa [#allocation3], 1 }
 0x2e4   :  { %335 = vsyncpa [#allocation6], 1 }
 0x2e5   :  { %336 = vsyncpa [#allocation9], 1 }
 0x2e6   :  { %337 = vsyncpa [#allocation4], 1 }

</bundles_post_ra>
